<compile_context>
chip_gen: v7x
topology: tpu7x:2x2x1
jax: 0.10.0
libtpu: 0.0.40
codegen_flags: <defaults>
</compile_context>

<pallas_src>
import functools

import jax
import jax.numpy as jnp
from jax.experimental import pallas as pl
from jax.experimental.pallas import tpu as pltpu


def _specaug_kernel(mF, mT, fs_ref, fw_ref, ts_ref, tw_ref, x_ref, o_ref):
    """Zero out frequency-mask rows and (per-batch) time-mask columns.

    fs_ref/fw_ref : (max(mF,1),)    int32 SMEM  freq mask start/width (shared across batch)
    ts_ref/tw_ref : (B*max(mT,1),)  int32 SMEM  time mask start/width (per batch, flat 1D)
    x_ref/o_ref   : (1, FREQ, tT)   VMEM tile for batch b = program_id(0),
                                    time tile t = program_id(1)
    """
    b = pl.program_id(0)
    _, f_dim, t_tile = x_ref.shape
    t0 = pl.program_id(1) * t_tile          # global time offset of this tile

    # ---- Frequency mask, separable along the sublane axis: (FREQ, 1) ----
    f_idx = jax.lax.broadcasted_iota(jnp.int32, (f_dim, 1), 0)
    fmask = None
    for i in range(mF):
        s = fs_ref[i]
        m = (f_idx >= s) & (f_idx < s + fw_ref[i])
        fmask = m if fmask is None else (fmask | m)
    if fmask is None:
        fmask = jnp.zeros((f_dim, 1), dtype=jnp.bool_)

    # ---- Time mask, separable along the lane axis: (1, tT), per batch element ----
    # Sampling guarantees start + width <= x_len[b], so no extra validity gate
    # is needed; frames beyond x_len[b] are (correctly) only touched by the
    # frequency masks, as in the reference module.
    t_idx = t0 + jax.lax.broadcasted_iota(jnp.int32, (1, t_tile), 1)
    tmask = None
    for j in range(mT):
        s = ts_ref[b * mT + j]
        m = (t_idx >= s) & (t_idx < s + tw_ref[b * mT + j])
        tmask = m if tmask is None else (tmask | m)
    if tmask is None:
        tmask = jnp.zeros((1, t_tile), dtype=jnp.bool_)

    # Single broadcast OR + select over the full tile.
    x = x_ref[0]
    o_ref[0] = jnp.where(fmask | tmask, jnp.zeros_like(x), x)


def spec_augment(x, x_len, *, spec_augment=True, mF=2, F=4, mT=2, pS=0.2,
                 key=None):
    """Forward pass of the SpecAugment module (x: (B, FREQ, TIME))."""
    if not spec_augment:
        return x

    B, f_dim, t_dim = x.shape
    if key is None:
        # NOTE: a fixed default key produces identical masks on every call;
        # pass a fresh key per training step for real augmentation.
        key = jax.random.PRNGKey(0)
    k_fv, k_fs, k_tv, k_ts = jax.random.split(key, 4)

    n_f = max(mF, 1)
    n_t = max(mT, 1)

    # ---- Frequency masks (torchaudio FrequencyMasking, iid_masks=False) ----
    F_eff = float(min(F, f_dim))                       # keep start sampling in-range
    fv = jax.random.uniform(k_fv, (n_f,), dtype=jnp.float32) * F_eff
    fmin = jax.random.uniform(k_fs, (n_f,), dtype=jnp.float32) * (float(f_dim) - fv)
    f_start = jnp.floor(fmin).astype(jnp.int32)
    f_width = (jnp.floor(fmin + fv) - jnp.floor(fmin)).astype(jnp.int32)

    # ---- Time masks (torchaudio TimeMasking, param = int(pS * x_len[b])) ----
    x_len_f = x_len.astype(jnp.float32)
    t_param = jnp.floor(float(pS) * x_len_f)                           # int(pS * x_len[b])
    tv = jax.random.uniform(k_tv, (B, n_t), dtype=jnp.float32) * t_param[:, None]
    tmin = jax.random.uniform(k_ts, (B, n_t), dtype=jnp.float32) * jnp.maximum(
        x_len_f[:, None] - tv, 0.0)
    t_start = jnp.floor(tmin).astype(jnp.int32).reshape(-1)            # 1D SMEM layout
    t_width = (jnp.floor(tmin + tv) - jnp.floor(tmin)).astype(jnp.int32).reshape(-1)

    # ---- Lane-dense TIME tiling: multiple of 128, sized to a VMEM budget ----
    LANE = 128
    itemsize = jnp.dtype(x.dtype).itemsize
    t_ceil = pl.cdiv(t_dim, LANE) * LANE
    # in + out tiles, double-buffered -> ~4 tiles live per step; budget ~8 MiB.
    budget = 8 * 1024 * 1024
    per_lane_bytes = max(f_dim * itemsize * 4, 1)
    max_lanes = max((budget // per_lane_bytes) // LANE * LANE, LANE)
    tT = int(min(t_ceil, max_lanes, 2048))
    t_pad = pl.cdiv(t_dim, tT) * tT                    # pad so tT divides evenly
    grid_t = t_pad // tT

    x_in = x if t_pad == t_dim else jnp.pad(x, ((0, 0), (0, 0), (0, t_pad - t_dim)))

    kern = functools.partial(_specaug_kernel, mF, mT)

    cost = pl.CostEstimate(flops=0, transcendentals=0,
                           bytes_accessed=2 * B * f_dim * t_pad * itemsize)

    out = pl.pallas_call(
        kern,
        out_shape=jax.ShapeDtypeStruct((B, f_dim, t_pad), x.dtype),
        grid_spec=pltpu.PrefetchScalarGridSpec(
            num_scalar_prefetch=4,
            grid=(B, grid_t),
            in_specs=[pl.BlockSpec((1, f_dim, tT), lambda b, t, *_: (b, 0, t))],
            out_specs=pl.BlockSpec((1, f_dim, tT), lambda b, t, *_: (b, 0, t)),
        ),
        compiler_params=pltpu.CompilerParams(
            dimension_semantics=("parallel", "parallel")),
        cost_estimate=cost,
    )(f_start, f_width, t_start, t_width, x_in)

    if t_pad != t_dim:
        out = out[:, :, :t_dim]
    return out


if __name__ == "__main__":
    key = jax.random.PRNGKey(0)
    k_x, k_masks = jax.random.split(key)

    B, FREQ, TIME = 2, 16, 256
    x = jax.random.normal(k_x, (B, FREQ, TIME), dtype=jnp.float32)
    x_len = jnp.array([256, 200], dtype=jnp.int32)

    out = spec_augment(x, x_len, spec_augment=True, mF=2, F=4, mT=2, pS=0.2,
                       key=k_masks)
    jax.block_until_ready(out)

    assert out.shape == x.shape and out.dtype == x.dtype
    # Sanity: masking can only zero entries, never change non-zero values to new ones.
    changed = jnp.logical_and(out != x, out != 0)
    assert not bool(jnp.any(changed))
    print("KERNEL_OK")
</pallas_src>

<mosaic_0001>
module attributes {stable_mosaic.version = 11 : i64} {
  func.func @_specaug_kernel(%arg0: i32, %arg1: i32, %arg2: memref<2xi32, #tpu.memory_space<smem>>, %arg3: memref<2xi32, #tpu.memory_space<smem>>, %arg4: memref<4xi32, #tpu.memory_space<smem>>, %arg5: memref<4xi32, #tpu.memory_space<smem>>, %arg6: memref<1x16x256xf32, #tpu.memory_space<vmem>>, %arg7: memref<1x16x256xf32, #tpu.memory_space<vmem>>) attributes {dimension_semantics = [#tpu.dimension_semantics<parallel>, #tpu.dimension_semantics<parallel>], iteration_bounds = array<i64: 2, 1>, scalar_prefetch = 4 : i64, scratch_operands = 0 : i64, tpu.core_type = #tpu.core_type<tc>, window_params = [{transform_indices = @transform_0, window_bounds = array<i64: 1, 16, 256>}, {transform_indices = @transform_1, window_bounds = array<i64: 1, 16, 256>}]} {
    %c256_i32 = arith.constant 256 : i32
    %0 = arith.muli %arg1, %c256_i32 : i32
    %1 = tpu.iota {dimensions = array<i32: 0>} : vector<16x1xi32>
    %c0 = arith.constant 0 : index
    %2 = memref.load %arg2[%c0] : memref<2xi32, #tpu.memory_space<smem>>
    %3 = vector.broadcast %2 : i32 to vector<16x1xi32>
    %4 = arith.cmpi sge, %1, %3 : vector<16x1xi32>
    %c0_0 = arith.constant 0 : index
    %5 = memref.load %arg3[%c0_0] : memref<2xi32, #tpu.memory_space<smem>>
    %6 = arith.addi %2, %5 : i32
    %7 = vector.broadcast %6 : i32 to vector<16x1xi32>
    %8 = arith.cmpi slt, %1, %7 : vector<16x1xi32>
    %9 = arith.andi %4, %8 : vector<16x1xi1>
    %c1 = arith.constant 1 : index
    %10 = memref.load %arg2[%c1] : memref<2xi32, #tpu.memory_space<smem>>
    %11 = vector.broadcast %10 : i32 to vector<16x1xi32>
    %12 = arith.cmpi sge, %1, %11 : vector<16x1xi32>
    %c1_1 = arith.constant 1 : index
    %13 = memref.load %arg3[%c1_1] : memref<2xi32, #tpu.memory_space<smem>>
    %14 = arith.addi %10, %13 : i32
    %15 = vector.broadcast %14 : i32 to vector<16x1xi32>
    %16 = arith.cmpi slt, %1, %15 : vector<16x1xi32>
    %17 = arith.andi %12, %16 : vector<16x1xi1>
    %18 = arith.ori %9, %17 : vector<16x1xi1>
    %19 = tpu.iota {dimensions = array<i32: 1>} : vector<1x256xi32>
    %20 = vector.broadcast %0 : i32 to vector<1x256xi32>
    %21 = arith.addi %20, %19 : vector<1x256xi32>
    %c2_i32 = arith.constant 2 : i32
    %22 = arith.muli %arg0, %c2_i32 : i32
    %c0_i32 = arith.constant 0 : i32
    %23 = arith.addi %22, %c0_i32 : i32
    %24 = arith.index_cast %23 : i32 to index
    %25 = memref.load %arg4[%24] : memref<4xi32, #tpu.memory_space<smem>>
    %26 = vector.broadcast %25 : i32 to vector<1x256xi32>
    %27 = arith.cmpi sge, %21, %26 : vector<1x256xi32>
    %c2_i32_2 = arith.constant 2 : i32
    %28 = arith.muli %arg0, %c2_i32_2 : i32
    %c0_i32_3 = arith.constant 0 : i32
    %29 = arith.addi %28, %c0_i32_3 : i32
    %30 = arith.index_cast %29 : i32 to index
    %31 = memref.load %arg5[%30] : memref<4xi32, #tpu.memory_space<smem>>
    %32 = arith.addi %25, %31 : i32
    %33 = vector.broadcast %32 : i32 to vector<1x256xi32>
    %34 = arith.cmpi slt, %21, %33 : vector<1x256xi32>
    %35 = arith.andi %27, %34 : vector<1x256xi1>
    %c2_i32_4 = arith.constant 2 : i32
    %36 = arith.muli %arg0, %c2_i32_4 : i32
    %c1_i32 = arith.constant 1 : i32
    %37 = arith.addi %36, %c1_i32 : i32
    %38 = arith.index_cast %37 : i32 to index
    %39 = memref.load %arg4[%38] : memref<4xi32, #tpu.memory_space<smem>>
    %40 = vector.broadcast %39 : i32 to vector<1x256xi32>
    %41 = arith.cmpi sge, %21, %40 : vector<1x256xi32>
    %c2_i32_5 = arith.constant 2 : i32
    %42 = arith.muli %arg0, %c2_i32_5 : i32
    %c1_i32_6 = arith.constant 1 : i32
    %43 = arith.addi %42, %c1_i32_6 : i32
    %44 = arith.index_cast %43 : i32 to index
    %45 = memref.load %arg5[%44] : memref<4xi32, #tpu.memory_space<smem>>
    %46 = arith.addi %39, %45 : i32
    %47 = vector.broadcast %46 : i32 to vector<1x256xi32>
    %48 = arith.cmpi slt, %21, %47 : vector<1x256xi32>
    %49 = arith.andi %41, %48 : vector<1x256xi1>
    %50 = arith.ori %35, %49 : vector<1x256xi1>
    %c0_7 = arith.constant 0 : index
    %c0_8 = arith.constant 0 : index
    %c0_9 = arith.constant 0 : index
    %51 = vector.load %arg6[%c0_7, %c0_8, %c0_9] : memref<1x16x256xf32, #tpu.memory_space<vmem>>, vector<1x16x256xf32>
    %52 = vector.shape_cast %51 : vector<1x16x256xf32> to vector<16x256xf32>
    %53 = vector.broadcast %18 : vector<16x1xi1> to vector<16x256xi1>
    %54 = vector.broadcast %50 : vector<1x256xi1> to vector<16x256xi1>
    %55 = arith.ori %53, %54 : vector<16x256xi1>
    %cst = arith.constant 0.000000e+00 : f32
    %56 = vector.broadcast %cst : f32 to vector<16x256xf32>
    %57 = arith.select %55, %56, %52 : vector<16x256xi1>, vector<16x256xf32>
    %c0_10 = arith.constant 0 : index
    %c0_11 = arith.constant 0 : index
    %c0_12 = arith.constant 0 : index
    %58 = vector.load %arg7[%c0_10, %c0_11, %c0_12] : memref<1x16x256xf32, #tpu.memory_space<vmem>>, vector<1x16x256xf32>
    %59 = vector.shape_cast %58 : vector<1x16x256xf32> to vector<16x256xf32>
    %60 = vector.shape_cast %57 : vector<16x256xf32> to vector<1x16x256xf32>
    tpu.vector_store %arg7[%c0_10, %c0_11, %c0_12], %60 {strides = array<i32>} : memref<1x16x256xf32, #tpu.memory_space<vmem>>, vector<1x16x256xf32>,
    return
  }
  func.func @transform_0(%arg0: i32, %arg1: i32, %arg2: memref<2xi32, #tpu.memory_space<smem>>, %arg3: memref<2xi32, #tpu.memory_space<smem>>, %arg4: memref<4xi32, #tpu.memory_space<smem>>, %arg5: memref<4xi32, #tpu.memory_space<smem>>) -> (i32, i32, i32) {
    %c0_i32 = arith.constant 0 : i32
    %c0_i32_0 = arith.constant 0 : i32
    return %arg0, %c0_i32, %arg1 : i32, i32, i32
  }
  func.func @transform_1(%arg0: i32, %arg1: i32, %arg2: memref<2xi32, #tpu.memory_space<smem>>, %arg3: memref<2xi32, #tpu.memory_space<smem>>, %arg4: memref<4xi32, #tpu.memory_space<smem>>, %arg5: memref<4xi32, #tpu.memory_space<smem>>) -> (i32, i32, i32) {
    %c0_i32 = arith.constant 0 : i32
    %c0_i32_0 = arith.constant 0 : i32
    return %arg0, %c0_i32, %arg1 : i32, i32, i32
  }
}

</mosaic_0001>

<bundles_post_ra>
// kernel: tpu_custom_call.1
= control target key start
LH: loop header
LB: loop body
LE: loop exit
PB: predicated region body
PF: predicated region fallthrough
CT: control target
= control target key end

     0   :  { %s943_s0 = inlined_call_operand.hbm [shape: s32[2], index: 0, kind: input, shape index: {}]   ;;  %s944_s4 = inlined_call_operand.hbm [shape: f32[2,16,256], index: 4, kind: input, shape index: {}]   ;;  %s945_s5 = inlined_call_operand.hbm [shape: f32[2,16,256], index: 5, kind: output, shape index: {}]   ;;  %s946_s1 = inlined_call_operand.vmem [shape: s32[2], index: 1, kind: input, shape index: {}]   ;;  %s947_s2 = inlined_call_operand.vmem [shape: s32[4], index: 2, kind: input, shape index: {}]   ;;  %s948_s3 = inlined_call_operand.vmem [shape: s32[4], index: 3, kind: input, shape index: {}]  }
   0x1   :  { %s452_s20 = scalar_lea.hbm %s943_s0, 16 }
   0x2   :  { %p453_p0 = scmp.ne.s32.totalorder %s943_s0, %s452_s20  ;;  %p456_p1 = scmp.lt.u32.totalorder %s452_s20, %s943_s0 }
   0x4   :  { %p458_p2 = pnand %p456_p1, %p453_p0 }
   0x6   :  { %461 = shalt.err (!%p458_p2)  }
   0x7   :  { %s614_s25 = smov [#allocation3]   ;;  %s12_s30 = sshll.u32 %s946_s1, 4  ;;  %s13_s30 = int_to_ptr.vmem [resolvable:$true] %s12_s30 }
   0x8   :  { %11 = dma.hbm_to_smem %s943_s0, 16, %s614_s25, [#allocation2] }
   0x9   :  { %s16_s8 = sshll.u32 %s947_s2, 4  ;;  %s462_s9 = scalar_lea.vmem %s13_s30, 16  ;;  %s17_s8 = int_to_ptr.vmem [resolvable:$true] %s16_s8 }
   0xa   :  { %p463_p3 = scmp.ne.s32.totalorder %s13_s30, %s462_s9  ;;  %p467_p4 = scmp.lt.s32.totalorder %s13_s30, %s13_s30 }
   0xb   :  { %p468_p5 = scmp.lt.s32.totalorder %s462_s9, %s462_s9 }
   0xd   :  { %p469_p6 = por %p468_p5, %p467_p4 }
   0xf   :  { %p470_p7 = pnand %p469_p6, %p463_p3 }
  0x11   :  { %473 = shalt.err (!%p470_p7)  }
  0x12   :  { %s615_s10 = smov [#allocation4]   ;;  %s20_s12 = sshll.u32 %s948_s3, 4  ;;  %s21_s12 = int_to_ptr.vmem [resolvable:$true] %s20_s12 }
  0x13   :  { %15 = dma.vmem_to_smem %s13_s30, 16, %s615_s10, [#allocation2] }
  0x14   :  { %s474_s1 = scalar_lea.vmem %s17_s8, 16  ;;  %p479_p9 = scmp.lt.s32.totalorder %s17_s8, %s17_s8 }
  0x15   :  { %p475_p8 = scmp.ne.s32.totalorder %s17_s8, %s474_s1  ;;  %p480_p10 = scmp.lt.s32.totalorder %s474_s1, %s474_s1 }
  0x17   :  { %p481_p11 = por %p480_p10, %p479_p9 }
  0x19   :  { %p482_p12 = pnand %p481_p11, %p475_p8 }
  0x1b   :  { %485 = shalt.err (!%p482_p12)  }
  0x1c   :  { %s616_s2 = smov [#allocation5]   ;;  %s486_s13 = scalar_lea.vmem %s21_s12, 16 }
  0x1d   :  { %19 = dma.vmem_to_smem %s17_s8, 16, %s616_s2, [#allocation2] }
  0x1e   :  { %p487_p13 = scmp.ne.s32.totalorder %s21_s12, %s486_s13  ;;  %p491_p0 = scmp.lt.s32.totalorder %s21_s12, %s21_s12 }
  0x1f   :  { %p492_p1 = scmp.lt.s32.totalorder %s486_s13, %s486_s13 }
  0x21   :  { %p493_p2 = por %p492_p1, %p491_p0 }
  0x23   :  { %p494_p3 = pnand %p493_p2, %p487_p13 }
  0x25   :  { %497 = shalt.err (!%p494_p3)  }
  0x26   :  { %s617_s14 = smov [#allocation6]  }
  0x27   :  { %23 = dma.vmem_to_smem %s21_s12, 16, %s617_s14, [#allocation2] }
  0x28   :  { %580 = dma.done.wait [#allocation2], 64 }
  0x29   :  { %581 = vsyncadd [#allocation2], 4294967232 }
  0x2a   :  { %25 = sfence }
  0x2b   :  { %26 = vsyncpa [#allocation8], 0 }
  0x2c   :  { %28 = vsyncpa [#allocation8 + $0x1], 0 }
  0x2d   :  { %29 = vsyncpa [#allocation9], 0 }
  0x2e   :  { %31 = vsyncpa [#allocation9 + $0x1], 0  ;;  %s675_s3 = smov 0   ;;  %s677_s15 = smov 0  }
  0x2f   :  { %s679_s16 = smov 0   ;;  %s681_s17 = smov 0  }
  0x30   :  { %s683_s18 = smov 0   ;;  %s685_s19 = smov 0  }
  0x31 LB: > { %s362_s20 = sadd.s32 4294967295, %s612_s19   ;;  %s363_s21 = sadd.s32 4294967294, %s612_s19   ;;  %s612_s19 = sphi %s685_s19, %s37_s19   ;;  %s608_s18 = sphi %s683_s18, %s977_s18   ;;  %s604_s17 = sphi %s681_s17, %s976_s17   ;;  %s600_s16 = sphi %s679_s16, %s975_s16   ;;  %s596_s15 = sphi %s677_s15, %s974_s15   ;;  %s592_s3 = sphi %s675_s3, %s973_s3  }
  0x32   : > { %s49_s22 = sadd.s32 1, %s608_s18  ;;  %s58_s23 = sadd.s32 1, %s600_s16 }
  0x33   : > { %p51_p4 = scmp.ge.s32.totalorder %s49_s22, 2  ;;  %p65_p5 = scmp.ne.s32.totalorder %s600_s16, %s596_s15 }
  0x34   : > { %p66_p6 = scmp.eq.s32.totalorder %s612_s19, 0  ;;  %p71_p7 = scmp.ne.s32.totalorder %s596_s15, %s592_s3 }
  0x35   : > { %s979_s22 = smov (%p51_p4, %s49_s22), 0  ;;  %p72_p9 = scmp.eq.s32.totalorder %s362_s20, 0 }
  0x36   : > { %p716_p8 = por %p66_p6, %p65_p5  ;;  %s53_s25 = ssub.s32 %s608_s18, %s979_s22 }
  0x37   : > { %p97_p10 = scmp.eq.s32.totalorder %s362_s20, 1  ;;  %p56_p11 = scmp.eq.s32.totalorder %s53_s25, 0 }
  0x38   : > { %p722_p12 = por %p72_p9, %p71_p7  ;;  %p103_p0 = scmp.eq.s32.totalorder %s363_s21, 1 }
  0x39   : > { %p726_p13 = por %p97_p10, %p65_p5  ;;  %p394_p3 = scmp.lt.s32.totalorder %s612_s19, 2 }
  0x3a   : > { %s731_s28 = scalar_select %p56_p11, %s600_s16, %s58_s23  }
  0x3b   : > { %s953_s27 = scalar_select %p726_p13, 1, 0 }
  0x3c   : > { %p733_p1 = por %p103_p0, %p71_p7  ;;  %s123_s30 = sand.u32 1, %s600_s16  }
  0x3d   : > { %s366_s6 = sshll.u32 %s123_s30, 5  ;;  %s380_s7 = sshll.u32 %s608_s18, 9 }
  0x3e   : > { %s954_s29 = scalar_select %p733_p1, 1, 0 }
  0x3f   : > { %s744_s10 = scalar_lea.hbm %s944_s4, %s380_s7  ;;  %s127_s0 = scalar_lea.vmem [#allocation7], %s366_s6 }
  0x40   : > { %s136_s11 = sshll.u32 %s127_s0, 4  ;;  %p750_p4 = pnand %p394_p3, %p716_p8  ;;  %s746_s11 = int_to_ptr.vmem [resolvable:$true] %s136_s11 }
  0x41   : > { %s755_s1 = scalar_lea.sflag [#allocation8], %s123_s30  ;;  %s498_s2 = scalar_lea.hbm %s744_s10, 512 }
  0x42   : > { %p499_p6 = scmp.ne.s32.totalorder %s744_s10, %s498_s2  ;;  %p500_p7 = pneg %p750_p4 }
  0x43   : > { %s503_s20 = scalar_lea.hbm %s944_s4, 1024  ;;  %p504_p8 = scmp.lt.u32.totalorder %s744_s10, %s944_s4 }
  0x44   : > { %p501_p9 = pnand %p500_p7, %p499_p6  ;;  %p505_p11 = scmp.lt.u32.totalorder %s503_s20, %s498_s2 }
  0x45   : > { %p507_p3 = scmp.lt.u32.totalorder %s498_s2, %s744_s10 }
  0x46   : > { %p502_p10 = pneg %p501_p9  ;;  %p506_p0 = por %p505_p11, %p504_p8 }
  0x48   : > { %p508_p2 = por %p507_p3, %p506_p0 }
  0x4a   : > { %p509_p5 = pnand %p508_p2, %p502_p10 }
  0x4c   : > { %512 = shalt.err (!%p509_p5)
}
  0x4d   : > { %s513_s24 = scalar_lea.vmem %s746_s11, 512  ;;  %s618_s25 = smov [#allocation7]  }
  0x4e   : > { %p514_p6 = scmp.ne.s32.totalorder %s746_s11, %s513_s24  ;;  %s518_s30 = sshll.u32 %s618_s25, 4  ;;  %s519_s30 = int_to_ptr.vmem [resolvable:$false] %s518_s30 }
  0x4f   : > { %s520_s6 = scalar_lea.vmem %s519_s30, 1024  ;;  %p521_p13 = scmp.lt.s32.totalorder %s746_s11, %s519_s30 }
  0x50   : > { %p516_p9 = pnand %p514_p6, %p500_p7  ;;  %p522_p8 = scmp.lt.s32.totalorder %s520_s6, %s513_s24 }
  0x52   : > { %p517_p1 = pneg %p516_p9  ;;  %p523_p11 = por %p522_p8, %p521_p13 }
  0x54   : > { %p524_p0 = pnand %p523_p11, %p517_p1 }
  0x56   : > { %527 = shalt.err (!%p524_p0)
}
  0x57   : > { %s619_s7 = smov 256   ;;  %s620_s8 = smov 16  }
  0x58   : > { %389 = dma.hbm_to_vmem [thread:$0]  (!%p750_p4), %s744_s10, 512, %s746_s11, %s755_s1, %s619_s7, %s619_s7, %s620_s8  }
  0x59   : > { %p144_p2 = scmp.lt.s32.totalorder %s612_s19, 3  ;;  %p956_p5 = scmp.ge.s32.totalorder %s612_s19, 1 }
  0x5b   : > { %p145_p7 = pnand %p956_p5, %p144_p2 }
  0x5c   : > { %s787_s9 = sand.u32 (!%p145_p7), 1, %s596_s15  }
  0x5d   : > { %148 = sbr.rel (%p145_p7) target bundleno = 144 (0x90), region = 24  ;;  %s370_s0 = sshll.u32 (!%p145_p7), %s787_s9, 5 }
  0x5e   : > { %s151_s2 = scalar_lea.sflag (!%p145_p7), [#allocation8], %s787_s9  ;;  %s793_s13 = scalar_lea.vmem (!%p145_p7), [#allocation7], %s370_s0 }
  0x64   : > { %583 = dma.done.wait (%p722_p12), %s151_s2, 512  }
  0x65   : > { %585 = vsyncadd (%p722_p12), %s151_s2, 4294966784  ;;  %s374_s10 = sshll.u32 %s604_s17, 1  ;;  %s800_s11 = sld [smem:[#allocation3]]  ;;  %v176_v0 = vlaneseq  ;;  %v235_v16 = vld [vmem:[%s793_s13] sm:$0xff]  ;;  %v236_v21 = vld [vmem:[%s793_s13 + $0x8] sm:$0xff] }
  0x66   : > { %s183_s12 = sld [smem:[#allocation4]]  ;;  %s802_s1 = sld [smem:[#allocation3 + $0x1]]  ;;  %v237_v23 = vld [vmem:[%s793_s13 + $0x10] sm:$0xff]  ;;  %v238_v24 = vld [vmem:[%s793_s13 + $0x18] sm:$0xff] }
  0x67   : > { %s373_s14 = sld [smem:[#allocation4 + $0x1]]  ;;  %s221_s26 = sadd.s32 1, %s374_s10  ;;  %v177_v1 = vshrl.u32 %v176_v0, 7  ;;  %v204_v2 = vand.u32 127, %v176_v0 }
  0x68   : > { %s804_s20 = sld [smem:[#allocation5 + %s374_s10]]  ;;  %s172_s8 = scalar_lea.vmem [#allocation10], %s370_s0 }
  0x69   : > { %s214_s21 = sld [smem:[#allocation6 + %s374_s10]]  ;;  %v205_v10 = vadd.s32 128, %v204_v2  ;;  %v178_v17 = vadd.s32 8, %v177_v1  ;;  %s275_s2 = sshll.u32 %s172_s8, 4  ;;  %s878_s2 = int_to_ptr.vmem [resolvable:$true] %s275_s2 }
  0x6a   : > { %s806_s23 = sld [smem:[#allocation5 + %s221_s26]]  ;;  %s381_s0 = sshll.u32 %s604_s17, 9 }
  0x6b   : > { %s226_s24 = sld [smem:[#allocation6 + %s221_s26]]  ;;  %v180_v3 = vstv %s800_s11  ;;  %s889_s17 = scalar_lea.hbm %s945_s5, %s381_s0 }
  0x6c   : > { %s184_s25 = sadd.s32 %s183_s12, %s800_s11  ;;  %vm181_vm0 = vcmp.ge.s32.totalorder %v177_v1, %v180_v3  ;;  %v191_v5 = vstv %s802_s1  ;;  %s260_s13 = scalar_lea.sflag [#allocation9], %s787_s9 }
  0x6d   : > { %v185_v4 = vstv %s184_s25  ;;  %s195_s30 = sadd.s32 %s373_s14, %s802_s1  ;;  %vm192_vm2 = vcmp.ge.s32.totalorder %v177_v1, %v191_v5  ;;  %s528_s12 = scalar_lea.vmem %s878_s2, 512 }
  0x6e   : > { %vm186_vm1 = vcmp.lt.s32.totalorder %v177_v1, %v185_v4  ;;  %v196_v6 = vstv %s195_s30  ;;  %v211_v7 = vstv %s804_s20  ;;  %p529_p12 = scmp.ne.s32.totalorder %s878_s2, %s528_s12  ;;  %p970_p13 = scmp.ne.s32.totalorder %s953_s27, 0 }
  0x6f   : > { %s215_s6 = sadd.s32 %s214_s21, %s804_s20  ;;  %vm814_vm3 = vmand %vm181_vm0, %vm186_vm1  ;;  %vm197_vm4 = vcmp.lt.s32.totalorder %v177_v1, %v196_v6  ;;  %vm212_vm5 = vcmp.ge.s32.totalorder %v204_v2, %v211_v7  ;;  %vm213_vm13 = vcmp.ge.s32.totalorder %v205_v10, %v211_v7  ;;  %s621_s1 = smov [#allocation10]  }
  0x70   : > { %v216_v9 = vstv %s215_s6  ;;  %vm818_vm6 = vmand %vm192_vm2, %vm197_vm4  ;;  %v223_v12 = vstv %s806_s23  ;;  %p530_p1 = pnand %p529_p12, %p970_p13  ;;  %s532_s14 = sshll.u32 %s621_s1, 4  ;;  %s533_s14 = int_to_ptr.vmem [resolvable:$false] %s532_s14 }
  0x71   : > { %vm217_vm7 = vcmp.lt.s32.totalorder %v204_v2, %v216_v9  ;;  %s227_s7 = sadd.s32 %s226_s24, %s806_s23  ;;  %vm201_vm8 = vmor %vm814_vm3, %vm818_vm6  ;;  %vm224_vm9 = vcmp.ge.s32.totalorder %v204_v2, %v223_v12  ;;  %vm218_vm14 = vcmp.lt.s32.totalorder %v205_v10, %v216_v9  ;;  %vm225_vm0 = vcmp.ge.s32.totalorder %v205_v10, %v223_v12  ;;  %s534_s20 = scalar_lea.vmem %s533_s14, 1024 }
  0x72   : > { %v228_v13 = vstv %s227_s7  ;;  %vm828_vm10 = vmand %vm212_vm5, %vm217_vm7  ;;  %vm182_vm7 = vcmp.ge.s32.totalorder %v178_v17, %v180_v3  ;;  %p531_p4 = pneg %p530_p1  ;;  %p535_p10 = scmp.lt.s32.totalorder %s878_s2, %s533_s14 }
  0x73   : > { %vm229_vm11 = vcmp.lt.s32.totalorder %v204_v2, %v228_v13  ;;  %vm230_vm1 = vcmp.lt.s32.totalorder %v205_v10, %v228_v13  ;;  %vm851_vm4 = vmand %vm213_vm13, %vm218_vm14  ;;  %vm193_vm13 = vcmp.ge.s32.totalorder %v178_v17, %v191_v5  ;;  %vm198_vm14 = vcmp.lt.s32.totalorder %v178_v17, %v196_v6  ;;  %p536_p3 = scmp.lt.s32.totalorder %s534_s20, %s528_s12 }
  0x74   : > { %vm832_vm12 = vmand %vm224_vm9, %vm229_vm11  ;;  %vm187_vm9 = vcmp.lt.s32.totalorder %v178_v17, %v185_v4 }
  0x75   : > { %vm950_vm15 = vmor %vm828_vm10, %vm832_vm12  ;;  %p537_p6 = por %p536_p3, %p535_p10 }
  0x76   : > { %vm247_vm2 = vmor %vm201_vm8, %vm950_vm15 }
  0x77   : > { %v251_v18 = vsel %vm247_vm2, 0.0, %v235_v16  ;;  %vm857_vm5 = vmand %vm225_vm0, %vm230_vm1  ;;  %p538_p9 = pnand %p537_p6, %p531_p4 }
  0x78   : > { %255 = vst [vmem:[%s172_s8] sm:$0xff] %v251_v18  ;;  %vm234_vm11 = vmor %vm851_vm4, %vm857_vm5 }
  0x79   : > { %vm248_vm0 = vmor %vm201_vm8, %vm234_vm11 }
  0x7a   : > { %v252_v22 = vsel %vm248_vm0, 0.0, %v236_v21  ;;  %vm189_vm1 = vmand %vm182_vm7, %vm187_vm9 }
  0x7b   : > { %256 = vst [vmem:[%s172_s8 + $0x8] sm:$0xff] %v252_v22  ;;  %vm200_vm2 = vmand %vm193_vm13, %vm198_vm14 }
  0x7c   : > { %vm202_vm15 = vmor %vm189_vm1, %vm200_vm2 }
  0x7d   : > { %vm969_vm3 = vmor %vm828_vm10, %vm832_vm12 }
  0x7e   : > { %vm249_vm6 = vmor %vm202_vm15, %vm969_vm3 }
  0x7f   : > { %v253_v25 = vsel %vm249_vm6, 0.0, %v237_v23  ;;  %vm250_vm8 = vmor %vm202_vm15, %vm234_vm11 }
  0x80   : > { %257 = vst [vmem:[%s172_s8 + $0x10] sm:$0xff] %v253_v25  ;;  %v254_v26 = vsel %vm250_vm8, 0.0, %v238_v24 }
  0x81   : > { %258 = vst [vmem:[%s172_s8 + $0x18] sm:$0xff] %v254_v26 }
  0x82   : > { %541 = shalt.err (!%p538_p9)
}
  0x83   : > { %s542_s21 = scalar_lea.hbm %s889_s17, 512  ;;  %s546_s24 = scalar_lea.hbm %s945_s5, 1024 }
  0x84   : > { %p543_p8 = scmp.ne.s32.totalorder %s889_s17, %s542_s21  ;;  %p547_p2 = scmp.lt.u32.totalorder %s889_s17, %s945_s5 }
  0x85   : > { %p548_p5 = scmp.lt.u32.totalorder %s546_s24, %s542_s21  ;;  %p550_p12 = scmp.lt.u32.totalorder %s542_s21, %s889_s17 }
  0x86   : > { %p544_p11 = pnand %p543_p8, %p970_p13 }
  0x87   : > { %p549_p7 = por %p548_p5, %p547_p2 }
  0x88   : > { %p545_p0 = pneg %p544_p11 }
  0x89   : > { %p551_p1 = por %p550_p12, %p549_p7 }
  0x8b   : > { %p552_p4 = pnand %p551_p1, %p545_p0 }
  0x8d   : > { %555 = shalt.err (!%p552_p4)
}
  0x8e   : > { %s622_s6 = smov 256   ;;  %s623_s7 = smov 16  }
  0x8f   : > { %384 = dma.vmem_to_hbm [thread:$0]  (%p970_p13), %s878_s2, 512, %s889_s17, %s260_s13, %s622_s6, %s622_s6, %s623_s7  }
  0x90 PF: > { %s290_s8 = sand.u32 1, %s592_s3   ;;  %p971_p10 = scmp.ne.s32.totalorder %s954_s29, 0 }
  0x91   : > { %p972_p3 = scmp.ge.s32.totalorder %s612_s19, 2  ;;  %s291_s0 = scalar_lea.sflag [#allocation9], %s290_s8 }
  0x93   : > { %p391_p6 = pnand %p972_p3, %p971_p10 }
  0x95   : > { %587 = dma.done.wait (!%p391_p6), %s291_s0, 512  }
  0x96   : > { %589 = vsyncadd (!%p391_p6), %s291_s0, 4294966784  ;;  %s37_s19 = sadd.s32 1, %s612_s19   ;;  %s973_s3 = smov %s596_s15 }
  0x97   : > { %p34_p9 = scmp.ge.s32.totalorder %s37_s19, 4   ;;  %s974_s15 = smov %s600_s16 }
  0x98   : > { %s975_s16 = smov %s731_s28  ;;  %s976_s17 = smov %s608_s18 }
  0x99   : > { %s977_s18 = smov %s979_s22  ;;  %36 = sbr.rel (!%p34_p9) target bundleno = 49 (0x31), region = 69 }
  0xa0   :  { %296 = vsyncpa [#allocation8], 1 }
  0xa1   :  { %298 = vsyncpa [#allocation8 + $0x1], 1 }
  0xa2   :  { %299 = vsyncpa [#allocation9], 1 }
  0xa3   :  { %301 = vsyncpa [#allocation9 + $0x1], 1 }

</bundles_post_ra>
